<compile_context>
chip_gen: v7x
topology: tpu7x:2x2x1
jax: 0.10.0
libtpu: 0.0.40
codegen_flags: <defaults>
</compile_context>

<pallas_src>
import jax
import jax.numpy as jnp
from jax.experimental import pallas as pl
from jax.experimental.pallas import tpu as pltpu


def _conv1x1_hardsigmoid_kernel(w_ref, b_ref, x_ref, o_ref):
    """Single invocation over the whole (small) batch.

    w_ref: (Cout, Cin)   VMEM  -- weight / 6
    b_ref: (Cout, 1)     VMEM  -- (bias + 3) / 6
    x_ref: (N, Cin, P)   VMEM  -- zero-padded input, spatial flattened (P = Hp*Wp)
    o_ref: (N, Cout, P)  VMEM  -- lane-dense output slab
    """
    n, cin, p = x_ref.shape
    cout = w_ref.shape[0]

    w = w_ref[...]                      # (Cout, Cin)
    b = b_ref[...]                      # (Cout, 1)

    # Hoist per-channel weight-column / bias broadcasts out of the batch loop
    # (JAX does not CSE broadcast_in_dim).
    w_cols = [jnp.broadcast_to(w[:, k:k + 1], (cout, p)) for k in range(cin)]
    b_full = jnp.broadcast_to(b, (cout, p))

    for i in range(n):                  # N is a tiny trace-time constant
        xi = x_ref[i]                   # (Cin, P)
        acc = b_full
        for k in range(cin):            # 1x1 conv == Cin broadcast FMAs (VPU)
            acc = acc + w_cols[k] * xi[k:k + 1, :]
        # Hard-sigmoid (constants already folded): clamp to [0, 1].
        o_ref[i] = jnp.clip(acc, 0.0, 1.0).astype(o_ref.dtype)


def conv1x1_hardsigmoid(x_nchw, weight, bias):
    """x_nchw: (N, Cin, H, W) f32; weight: (Cout, Cin, 1, 1); bias: (Cout,)."""
    n, cin, h, w = x_nchw.shape
    cout = weight.shape[0]
    hp, wp = h + 2, w + 2
    p = hp * wp

    # Fold the hard-sigmoid affine transform into the tiny parameters:
    #   clamp(w.x + b + 3, 0, 6)/6 == clamp((w/6).x + (b+3)/6, 0, 1)
    w_f = (weight.reshape(cout, cin) / 6.0).astype(jnp.float32)
    b_f = ((bias + 3.0) / 6.0).reshape(cout, 1).astype(jnp.float32)

    # Zero-pad spatially by 1 (tiny), then flatten spatial dims (contiguous
    # reshape -> free).  Border pixels then fall out of the same FMA path.
    xp = jnp.pad(x_nchw, ((0, 0), (0, 0), (1, 1), (1, 1)))
    x_flat = xp.reshape(n, cin, p)

    out = pl.pallas_call(
        _conv1x1_hardsigmoid_kernel,
        out_shape=jax.ShapeDtypeStruct((n, cout, p), x_nchw.dtype),
        in_specs=[
            pl.BlockSpec(memory_space=pltpu.MemorySpace.VMEM),  # w_f
            pl.BlockSpec(memory_space=pltpu.MemorySpace.VMEM),  # b_f
            pl.BlockSpec(memory_space=pltpu.MemorySpace.VMEM),  # x_flat
        ],
        out_specs=pl.BlockSpec(memory_space=pltpu.MemorySpace.VMEM),
    )(w_f, b_f, x_flat)

    # Contiguous reshape back to NCHW padded layout -> free.
    return out.reshape(n, cout, hp, wp)


if __name__ == "__main__":
    key = jax.random.PRNGKey(0)
    k_x, k_w, k_b = jax.random.split(key, 3)

    # Small shapes consistent with the module: Cin=3, Cout=8 fixed by the conv.
    N, CIN, COUT, H, W = 2, 3, 8, 16, 16
    x = jax.random.normal(k_x, (N, CIN, H, W), jnp.float32)

    # Deterministic parameter init (Conv2d(3, 8, 1) shapes).
    fan_in = CIN * 1 * 1
    bound = 1.0 / (fan_in ** 0.5)
    weight = jax.random.uniform(k_w, (COUT, CIN, 1, 1), jnp.float32,
                                minval=-bound, maxval=bound)
    bias = jax.random.uniform(k_b, (COUT,), jnp.float32,
                              minval=-bound, maxval=bound)

    out = jax.block_until_ready(conv1x1_hardsigmoid(x, weight, bias))

    # Pure-JAX reference: 1x1 conv with padding=1, then (x+3).clamp(0,6)/6.
    xp = jnp.pad(x, ((0, 0), (0, 0), (1, 1), (1, 1)))
    ref = jnp.einsum('nchw,oc->nohw', xp, weight.reshape(COUT, CIN)) \
        + bias[None, :, None, None]
    ref = jnp.clip(ref + 3.0, 0.0, 6.0) / 6.0

    assert out.shape == (N, COUT, H + 2, W + 2), out.shape
    assert jnp.allclose(out, ref, atol=1e-5, rtol=1e-5), \
        float(jnp.max(jnp.abs(out - ref)))
    print("KERNEL_OK")
</pallas_src>

<mosaic_0001>
module attributes {stable_mosaic.version = 11 : i64} {
  func.func @_conv1x1_hardsigmoid_kernel(%arg0: memref<8x3xf32, #tpu.memory_space<vmem>>, %arg1: memref<8x1xf32, #tpu.memory_space<vmem>>, %arg2: memref<2x3x324xf32, #tpu.memory_space<vmem>>, %arg3: memref<2x8x324xf32, #tpu.memory_space<vmem>>) attributes {dimension_semantics = [], scalar_prefetch = 0 : i64, scratch_operands = 0 : i64, tpu.core_type = #tpu.core_type<tc>} {
    %c0 = arith.constant 0 : index
    %c0_0 = arith.constant 0 : index
    %0 = vector.load %arg0[%c0, %c0_0] : memref<8x3xf32, #tpu.memory_space<vmem>>, vector<8x3xf32>
    %c0_1 = arith.constant 0 : index
    %c0_2 = arith.constant 0 : index
    %1 = vector.load %arg1[%c0_1, %c0_2] : memref<8x1xf32, #tpu.memory_space<vmem>>, vector<8x1xf32>
    %2 = vector.extract_strided_slice %0 {offsets = [0, 0], sizes = [8, 1], strides = [1, 1]} : vector<8x3xf32> to vector<8x1xf32>
    %3 = vector.shape_cast %2 : vector<8x1xf32> to vector<8x1xf32>
    %4 = vector.broadcast %3 : vector<8x1xf32> to vector<8x324xf32>
    %5 = vector.extract_strided_slice %0 {offsets = [0, 1], sizes = [8, 1], strides = [1, 1]} : vector<8x3xf32> to vector<8x1xf32>
    %6 = vector.shape_cast %5 : vector<8x1xf32> to vector<8x1xf32>
    %7 = vector.broadcast %6 : vector<8x1xf32> to vector<8x324xf32>
    %8 = vector.extract_strided_slice %0 {offsets = [0, 2], sizes = [8, 1], strides = [1, 1]} : vector<8x3xf32> to vector<8x1xf32>
    %9 = vector.shape_cast %8 : vector<8x1xf32> to vector<8x1xf32>
    %10 = vector.broadcast %9 : vector<8x1xf32> to vector<8x324xf32>
    %11 = vector.shape_cast %1 : vector<8x1xf32> to vector<8x1xf32>
    %12 = vector.broadcast %11 : vector<8x1xf32> to vector<8x324xf32>
    %c0_3 = arith.constant 0 : index
    %c0_4 = arith.constant 0 : index
    %c0_5 = arith.constant 0 : index
    %13 = vector.load %arg2[%c0_3, %c0_4, %c0_5] : memref<2x3x324xf32, #tpu.memory_space<vmem>>, vector<1x3x324xf32>
    %14 = vector.shape_cast %13 : vector<1x3x324xf32> to vector<3x324xf32>
    %15 = vector.extract_strided_slice %14 {offsets = [0, 0], sizes = [1, 324], strides = [1, 1]} : vector<3x324xf32> to vector<1x324xf32>
    %16 = vector.broadcast %15 : vector<1x324xf32> to vector<8x324xf32>
    %17 = arith.mulf %4, %16 : vector<8x324xf32>
    %18 = arith.addf %12, %17 : vector<8x324xf32>
    %19 = vector.extract_strided_slice %14 {offsets = [1, 0], sizes = [1, 324], strides = [1, 1]} : vector<3x324xf32> to vector<1x324xf32>
    %20 = vector.broadcast %19 : vector<1x324xf32> to vector<8x324xf32>
    %21 = arith.mulf %7, %20 : vector<8x324xf32>
    %22 = arith.addf %18, %21 : vector<8x324xf32>
    %23 = vector.extract_strided_slice %14 {offsets = [2, 0], sizes = [1, 324], strides = [1, 1]} : vector<3x324xf32> to vector<1x324xf32>
    %24 = vector.broadcast %23 : vector<1x324xf32> to vector<8x324xf32>
    %25 = arith.mulf %10, %24 : vector<8x324xf32>
    %26 = arith.addf %22, %25 : vector<8x324xf32>
    %cst = arith.constant 0.000000e+00 : f32
    %cst_6 = arith.constant 1.000000e+00 : f32
    %27 = vector.broadcast %cst : f32 to vector<8x324xf32>
    %28 = arith.maximumf %27, %26 : vector<8x324xf32>
    %29 = vector.broadcast %cst_6 : f32 to vector<8x324xf32>
    %30 = arith.minimumf %29, %28 : vector<8x324xf32>
    %c0_7 = arith.constant 0 : index
    %c0_8 = arith.constant 0 : index
    %c0_9 = arith.constant 0 : index
    %31 = vector.load %arg3[%c0_7, %c0_8, %c0_9] : memref<2x8x324xf32, #tpu.memory_space<vmem>>, vector<1x8x324xf32>
    %32 = vector.shape_cast %31 : vector<1x8x324xf32> to vector<8x324xf32>
    %33 = vector.shape_cast %30 : vector<8x324xf32> to vector<1x8x324xf32>
    tpu.vector_store %arg3[%c0_7, %c0_8, %c0_9], %33 {strides = array<i32>} : memref<2x8x324xf32, #tpu.memory_space<vmem>>, vector<1x8x324xf32>,
    %c1 = arith.constant 1 : index
    %c0_10 = arith.constant 0 : index
    %c0_11 = arith.constant 0 : index
    %34 = vector.load %arg2[%c1, %c0_10, %c0_11] : memref<2x3x324xf32, #tpu.memory_space<vmem>>, vector<1x3x324xf32>
    %35 = vector.shape_cast %34 : vector<1x3x324xf32> to vector<3x324xf32>
    %36 = vector.extract_strided_slice %35 {offsets = [0, 0], sizes = [1, 324], strides = [1, 1]} : vector<3x324xf32> to vector<1x324xf32>
    %37 = vector.broadcast %36 : vector<1x324xf32> to vector<8x324xf32>
    %38 = arith.mulf %4, %37 : vector<8x324xf32>
    %39 = arith.addf %12, %38 : vector<8x324xf32>
    %40 = vector.extract_strided_slice %35 {offsets = [1, 0], sizes = [1, 324], strides = [1, 1]} : vector<3x324xf32> to vector<1x324xf32>
    %41 = vector.broadcast %40 : vector<1x324xf32> to vector<8x324xf32>
    %42 = arith.mulf %7, %41 : vector<8x324xf32>
    %43 = arith.addf %39, %42 : vector<8x324xf32>
    %44 = vector.extract_strided_slice %35 {offsets = [2, 0], sizes = [1, 324], strides = [1, 1]} : vector<3x324xf32> to vector<1x324xf32>
    %45 = vector.broadcast %44 : vector<1x324xf32> to vector<8x324xf32>
    %46 = arith.mulf %10, %45 : vector<8x324xf32>
    %47 = arith.addf %43, %46 : vector<8x324xf32>
    %cst_12 = arith.constant 0.000000e+00 : f32
    %cst_13 = arith.constant 1.000000e+00 : f32
    %48 = vector.broadcast %cst_12 : f32 to vector<8x324xf32>
    %49 = arith.maximumf %48, %47 : vector<8x324xf32>
    %50 = vector.broadcast %cst_13 : f32 to vector<8x324xf32>
    %51 = arith.minimumf %50, %49 : vector<8x324xf32>
    %c1_14 = arith.constant 1 : index
    %c0_15 = arith.constant 0 : index
    %c0_16 = arith.constant 0 : index
    %52 = vector.load %arg3[%c1_14, %c0_15, %c0_16] : memref<2x8x324xf32, #tpu.memory_space<vmem>>, vector<1x8x324xf32>
    %53 = vector.shape_cast %52 : vector<1x8x324xf32> to vector<8x324xf32>
    %54 = vector.shape_cast %51 : vector<8x324xf32> to vector<1x8x324xf32>
    tpu.vector_store %arg3[%c1_14, %c0_15, %c0_16], %54 {strides = array<i32>} : memref<2x8x324xf32, #tpu.memory_space<vmem>>, vector<1x8x324xf32>,
    return
  }
}

</mosaic_0001>

<bundles_post_ra>
// kernel: tpu_custom_call.1
= control target key start
LH: loop header
LB: loop body
LE: loop exit
PB: predicated region body
PF: predicated region fallthrough
CT: control target
= control target key end

     0   :  { %v315_v2 = vmov 0   ;;  %s397_s0 = inlined_call_operand.vmem [shape: f32[8,3], index: 0, kind: input, shape index: {}]   ;;  %s398_s1 = inlined_call_operand.vmem [shape: f32[8,1], index: 1, kind: input, shape index: {}]   ;;  %s399_s2 = inlined_call_operand.vmem [shape: f32[2,3,324], index: 2, kind: input, shape index: {}]   ;;  %s400_s3 = inlined_call_operand.hbm [shape: f32[2,8,324], index: 3, kind: output, shape index: {}]  }
   0x1   :  { %v15_v0 = vld [vmem:[%s397_s0] sm:$0xff]  ;;  %286 = vset.pattern.permute.xlu0 %v315_v2  ;;  %288 = vset.pattern.permute.xlu1 %v315_v2 }
   0x2   :  { %v16_v1 = vld [vmem:[%s398_s1] sm:$0xff]  ;;  %19 = vperm.xlu0 %286, %v15_v0  }
   0x3   :  { %32 = vperm.xlu1 %288, %v16_v1  }
   0x4   :  { %8 = vsyncpa [#allocation3], 0  ;;  %v316_v3 = vmov 1   ;;  %v317_v4 = vmov 2   ;;  %v39_v5 = vlaneseq  ;;  %v35_v9 = vld [vmem:[%s399_s2] sm:$0x77] }
   0x5   :  { %v36_v10 = vld [vmem:[%s399_s2 + $0x8] sm:$0x7]  ;;  %v278_v12 = vld [vmem:[%s399_s2 + $0xc] sm:$0x77]  ;;  %v279_v13 = vld [vmem:[%s399_s2 + $0x14] sm:$0x7] }
   0x6   :  { %287 = vset.pattern.permute.xlu0 %v316_v3  ;;  %v40_v6 = vshrl.u32 %v39_v5, 7  ;;  %s318_s2 = smov [#allocation2]   ;;  %vm146_vm0 = vcmask 556032  }
   0x7   :  { %289 = vset.pattern.permute.xlu1 %v317_v4  ;;  %23 = vperm.xlu0 %287, %v15_v0   ;;  %s267_s22 = sshll.u32 %s318_s2, 4  ;;  %s268_s22 = int_to_ptr.vmem [resolvable:$true] %s267_s22 }
   0x8   :  { %27 = vperm.xlu1 %289, %v15_v0   ;;  %v41_v7 = vsub.s32 0, %v40_v6  ;;  %v45_v8 = vsub.s32 4, %v40_v6  ;;  %v353_v11 = vsub.s32 1, %v40_v6  ;;  %v78_v14 = vsub.s32 5, %v40_v6  ;;  %s291_s23 = scalar_lea.vmem %s268_s22, 768  ;;  %p296_p1 = scmp.lt.s32.totalorder %s268_s22, %s268_s22 }
   0x9   :  { %v362_v23 = vsub.s32 2, %v40_v6  ;;  %v111_v24 = vsub.s32 6, %v40_v6  ;;  %p292_p0 = scmp.ne.s32.totalorder %s268_s22, %s291_s23  ;;  %p297_p2 = scmp.lt.s32.totalorder %s291_s23, %s291_s23 }
   0xa   :  { %v42_v15 = vrot.slane %v35_v9, %v41_v7  ;;  %v46_v16 = vrot.slane %v35_v9, %v45_v8  ;;  %v50_v17 = vrot.slane %v36_v10, %v41_v7  ;;  %v156_v18 = vrot.slane %v278_v12, %v41_v7 }
   0xb   :  { %290 = vset.pattern.permute.xlu0 %v315_v2  ;;  %v160_v19 = vrot.slane %v278_v12, %v45_v8  ;;  %v164_v20 = vrot.slane %v279_v13, %v41_v7  ;;  %v75_v21 = vrot.slane %v35_v9, %v353_v11  ;;  %v79_v22 = vrot.slane %v35_v9, %v78_v14  ;;  %p298_p3 = por %p297_p2, %p296_p1 }
   0xc   :  { %v57_v25 = vrot.slane %v42_v15, %v41_v7  ;;  %v61_v26 = vrot.slane %v46_v16, %v41_v7  ;;  %v83_v27 = vrot.slane %v36_v10, %v353_v11  ;;  %v189_v28 = vrot.slane %v278_v12, %v353_v11 }
   0xd   :  { %v65_v29 = vrot.slane %v50_v17, %v41_v7  ;;  %v171_v30 = vrot.slane %v156_v18, %v41_v7  ;;  %v175_v31 = vrot.slane %v160_v19, %v41_v7  ;;  %v179_v32 = vrot.slane %v164_v20, %v41_v7  ;;  %p299_p4 = pnand %p298_p3, %p292_p0 }
   0xe   :  { %v90_v33 = vrot.slane %v75_v21, %v353_v11  ;;  %v94_v34 = vrot.slane %v79_v22, %v353_v11  ;;  %v193_v35 = vrot.slane %v278_v12, %v78_v14  ;;  %v197_v36 = vrot.slane %v279_v13, %v353_v11 }
   0xf   :  { %v108_v37 = vrot.slane %v35_v9, %v362_v23  ;;  %v112_v38 = vrot.slane %v35_v9, %v111_v24  ;;  %v116_v39 = vrot.slane %v36_v10, %v362_v23  ;;  %v222_v40 = vrot.slane %v278_v12, %v362_v23 }
  0x10   :  { %v98_v43 = vrot.slane %v83_v27, %v353_v11  ;;  %v204_v44 = vrot.slane %v189_v28, %v353_v11  ;;  %v226_v45 = vrot.slane %v278_v12, %v111_v24  ;;  %v230_v46 = vrot.slane %v279_v13, %v362_v23 }
  0x11   :  { %v208_v53 = vrot.slane %v193_v35, %v353_v11  ;;  %v212_v54 = vrot.slane %v197_v36, %v353_v11  ;;  %v123_v55 = vrot.slane %v108_v37, %v362_v23  ;;  %v127_v56 = vrot.slane %v112_v38, %v362_v23 }
  0x12   :  { %v131_v57 = vrot.slane %v116_v39, %v362_v23  ;;  %v237_v58 = vrot.slane %v222_v40, %v362_v23  ;;  %v241_v61 = vrot.slane %v226_v45, %v362_v23  ;;  %v245_v62 = vrot.slane %v230_v46, %v362_v23 }
  0x81   :  { %v20_v41 = vpop.permute.xlu0 %19 }
  0x82   :  { %v33_v42 = vpop.permute.xlu1 %32  ;;  %v66_v47 = vmul.f32 %v57_v25, %v20_v41  ;;  %v67_v48 = vmul.f32 %v61_v26, %v20_v41  ;;  %v68_v49 = vmul.f32 %v65_v29, %v20_v41  ;;  %v180_v50 = vmul.f32 %v171_v30, %v20_v41 }
  0x83   :  { %v181_v51 = vmul.f32 %v175_v31, %v20_v41  ;;  %v182_v52 = vmul.f32 %v179_v32, %v20_v41 }
  0x84   :  { %v69_v59 = vadd.f32 %v66_v47, %v33_v42  ;;  %v70_v60 = vadd.f32 %v67_v48, %v33_v42  ;;  %v71_v63 = vadd.f32 %v68_v49, %v33_v42  ;;  %v183_v0 = vadd.f32 %v180_v50, %v33_v42 }
  0x85   :  { %v184_v1 = vadd.f32 %v181_v51, %v33_v42  ;;  %v185_v2 = vadd.f32 %v182_v52, %v33_v42 }
  0x86   :  { %v24_v3 = vpop.permute.xlu0 %23 }
  0x87   :  { %v28_v4 = vpop.permute.xlu1 %27  ;;  %v99_v5 = vmul.f32 %v90_v33, %v24_v3  ;;  %v100_v6 = vmul.f32 %v94_v34, %v24_v3  ;;  %v101_v7 = vmul.f32 %v98_v43, %v24_v3  ;;  %v213_v8 = vmul.f32 %v204_v44, %v24_v3 }
  0x88   :  { %v214_v9 = vmul.f32 %v208_v53, %v24_v3  ;;  %v215_v10 = vmul.f32 %v212_v54, %v24_v3  ;;  %v132_v11 = vmul.f32 %v123_v55, %v28_v4  ;;  %v133_v12 = vmul.f32 %v127_v56, %v28_v4 }
  0x89   :  { %v102_v13 = vadd.f32 %v99_v5, %v69_v59  ;;  %v103_v14 = vadd.f32 %v100_v6, %v70_v60  ;;  %v104_v15 = vadd.f32 %v101_v7, %v71_v63  ;;  %v216_v16 = vadd.f32 %v213_v8, %v183_v0 }
  0x8a   :  { %v217_v17 = vadd.f32 %v214_v9, %v184_v1  ;;  %v218_v18 = vadd.f32 %v215_v10, %v185_v2  ;;  %v134_v19 = vmul.f32 %v131_v57, %v28_v4  ;;  %v246_v20 = vmul.f32 %v237_v58, %v28_v4 }
  0x8b   :  { %v135_v21 = vadd.f32 %v132_v11, %v102_v13  ;;  %v136_v22 = vadd.f32 %v133_v12, %v103_v14  ;;  %v247_v23 = vmul.f32 %v241_v61, %v28_v4  ;;  %v248_v24 = vmul.f32 %v245_v62, %v28_v4 }
  0x8c   :  { %v137_v25 = vadd.f32 %v134_v19, %v104_v15  ;;  %v249_v26 = vadd.f32 %v246_v20, %v216_v16 }
  0x8d   :  { %v138_v27 = vmax.f32 %v135_v21, 0.0  ;;  %v139_v28 = vmax.f32 %v136_v22, 0.0  ;;  %v250_v29 = vadd.f32 %v247_v23, %v217_v17  ;;  %v251_v30 = vadd.f32 %v248_v24, %v218_v18 }
  0x8e   :  { %v140_v31 = vmax.f32 %v137_v25, 0.0  ;;  %v252_v32 = vmax.f32 %v249_v26, 0.0 }
  0x8f   :  { %v141_v33 = vmin.f32 %v138_v27, 1.0  ;;  %v142_v34 = vmin.f32 %v139_v28, 1.0  ;;  %v253_v35 = vmax.f32 %v250_v29, 0.0  ;;  %v254_v36 = vmax.f32 %v251_v30, 0.0 }
  0x90   :  { %v143_v37 = vmin.f32 %v140_v31, 1.0  ;;  %v255_v38 = vmin.f32 %v252_v32, 1.0 }
  0x91   :  { %144 = vst [vmem:[#allocation2] sm:$0xff] %v141_v33  ;;  %145 = vst [vmem:[#allocation2 + $0x8] sm:$0xff] %v142_v34  ;;  %v256_v39 = vmin.f32 %v253_v35, 1.0  ;;  %v257_v40 = vmin.f32 %v254_v36, 1.0 }
  0x92   :  { %147 = vst.msk [vmem:[#allocation2 + $0x10] sm:$0xff] %vm146_vm0, %v143_v37  ;;  %259 = vst [vmem:[#allocation2 + $0x18] sm:$0xff] %v255_v38 }
  0x93   :  { %260 = vst [vmem:[#allocation2 + $0x20] sm:$0xff] %v256_v39  ;;  %261 = vst.msk [vmem:[#allocation2 + $0x28] sm:$0xff] %vm146_vm0, %v257_v40 }
  0x94   :  { %302 = shalt.err (!%p299_p4)
}
  0x95   :  { %s303_s26 = scalar_lea.hbm %s400_s3, 768 }
  0x96   :  { %p304_p5 = scmp.ne.s32.totalorder %s400_s3, %s303_s26  ;;  %p307_p6 = scmp.lt.u32.totalorder %s303_s26, %s400_s3 }
  0x98   :  { %p309_p7 = pnand %p307_p6, %p304_p5 }
  0x9a   :  { %312 = shalt.err (!%p309_p7)
}
  0x9b   :  { %s319_s4 = smov 384   ;;  %s320_s5 = smov 24  }
  0x9c   :  { %273 = dma.vmem_to_hbm [thread:$0]  %s268_s22, 768, %s400_s3, [#allocation3], %s319_s4, %s319_s4, %s320_s5  }
  0x9d   :  { %313 = dma.done.wait [#allocation3], 768  }
  0x9e   :  { %314 = vsyncadd [#allocation3], 4294966528 }
  0x9f   :  { %277 = vsyncpa [#allocation3], 1 }

</bundles_post_ra>
